<compile_context>
chip_gen: v6e
topology: v6e:2x2x1
jax: 0.10.0
libtpu: 0.0.40
codegen_flags: <defaults>
</compile_context>

<pallas_src>
import functools

import jax
import jax.numpy as jnp
from jax import lax
from jax.experimental import pallas as pl
from jax.experimental.pallas import tpu as pltpu

_LANE = 128
_INPUT_VMEM_BUDGET = 16 << 20   # bytes for double-buffered input tiles (2 inputs x 2 bufs)


def _round_up(x: int, m: int) -> int:
    return (x + m - 1) // m * m


def _sublane_multiple(*dtypes) -> int:
    # f32 -> 8, bf16 -> 16, int8/fp8 -> 32 (sub-32-bit packs along sublanes).
    b = min(jnp.dtype(d).itemsize for d in dtypes)
    return 8 * max(1, 4 // max(1, b))


def _num_tensorcores() -> int:
    # Best effort: v7x has 2 TensorCores per chip, v5e/v6e have 1.
    try:
        info = pltpu.get_tpu_info()
        for attr in ("num_tensorcores", "tensorcore_count", "num_cores",
                     "cores_per_chip"):
            v = getattr(info, attr, None)
            if isinstance(v, int) and 1 <= v <= 8:
                return v
    except Exception:
        pass
    return 1


def _rmse_partial_kernel(y_ref, yhat_ref, o_ref, acc_ref, *,
                         rows_total, tile_m, steps_per_part, nblocks,
                         tail_partial, has_clamp, acc_rows):
    i = pl.program_id(1)          # reduction ("arbitrary") axis within this partition

    @pl.when(i == 0)
    def _():
        acc_ref[...] = jnp.zeros_like(acc_ref)

    d = y_ref[...].astype(jnp.float32) - yhat_ref[...].astype(jnp.float32)
    dd = d * d

    def _accumulate(vals):
        if acc_rows == 8:
            # Leading-axis sum = pure vreg adds (no XLU); result matches the
            # small fixed (8, 128) accumulator. Reshape keeps (8,128) tiling.
            acc_ref[...] += vals.reshape(tile_m // 8, 8, _LANE).sum(axis=0)
        else:
            # Tiny full-extent tile (tile_m not 8-aligned): one small reduce.
            acc_ref[...] += jnp.sum(vals, axis=0, keepdims=True)

    if not tail_partial and not has_clamp:
        # Every block is exact: bare streaming accumulate, no mask ops at all.
        _accumulate(dd)
    else:
        c = pl.program_id(0)
        g_block = c * steps_per_part + i
        last = nblocks - 1
        if tail_partial:
            @pl.when(g_block < last)
            def _():
                _accumulate(dd)

            @pl.when(g_block == last)
            def _():
                # Only the tail block pays for the iota/compare/select.
                row = lax.broadcasted_iota(jnp.int32, dd.shape, 0)
                g_row = last * tile_m + row
                _accumulate(jnp.where(g_row < rows_total, dd, jnp.float32(0.0)))
            # g_block > last: clamped duplicate block of the last partition,
            # contributes nothing (accumulation skipped).
        else:
            # Only clamped duplicate blocks need skipping; real blocks exact.
            @pl.when(g_block <= last)
            def _():
                _accumulate(dd)

    @pl.when(i == steps_per_part - 1)
    def _():
        # One cross-lane/sublane reduce per partition, in the epilogue only.
        o_ref[0, 0] = jnp.sum(acc_ref[...])


def _sse_pallas(y2d: jax.Array, yh2d: jax.Array) -> jax.Array:
    """Sum of squared errors over a (rows, 128) slab, via Pallas."""
    rows = y2d.shape[0]
    sub = _sublane_multiple(y2d.dtype, yh2d.dtype)
    p = _num_tensorcores()

    # Double-buffered input bytes per row: 2 pipeline buffers x (y + y_hat).
    per_row = 2 * _LANE * (y2d.dtype.itemsize + yh2d.dtype.itemsize)
    cap = max(sub, (_INPUT_VMEM_BUDGET // per_row) // sub * sub)

    tile_m = min(cap, _round_up(pl.cdiv(rows, p), sub))
    if tile_m > rows:
        tile_m = rows            # full-extent exception to the (8,128) rule

    nblocks = pl.cdiv(rows, tile_m)
    steps = pl.cdiv(nblocks, p)             # reduction steps per partition
    has_clamp = (p * steps != nblocks)      # last partition has spare steps
    tail_partial = (rows % tile_m != 0)     # last block extends past `rows`
    acc_rows = 8 if tile_m % 8 == 0 else 1

    if has_clamp:
        # Spare steps of the last partition re-read the last valid block
        # (skipped in-kernel) instead of issuing an out-of-bounds DMA.
        def row_block(c, i):
            return (jnp.minimum(c * steps + i, nblocks - 1), 0)
    else:
        def row_block(c, i):
            return (c * steps + i, 0)

    # Raise the scoped-VMEM limit so the big-tile config also works under
    # v5e's 16 MiB default; 32 MiB is within physical VMEM on v5e/v6e/v7x.
    vmem_need = tile_m * per_row + acc_rows * _LANE * 4
    vmem_limit = max(32 << 20, vmem_need + (4 << 20))

    kernel = functools.partial(
        _rmse_partial_kernel,
        rows_total=rows, tile_m=tile_m, steps_per_part=steps,
        nblocks=nblocks, tail_partial=tail_partial, has_clamp=has_clamp,
        acc_rows=acc_rows)

    partials = pl.pallas_call(
        kernel,
        out_shape=jax.ShapeDtypeStruct((p, 1), jnp.float32),
        grid=(p, steps),
        in_specs=[
            pl.BlockSpec((tile_m, _LANE), row_block),
            pl.BlockSpec((tile_m, _LANE), row_block),
        ],
        out_specs=pl.BlockSpec((1, 1), lambda c, i: (c, 0),
                               memory_space=pltpu.SMEM),
        scratch_shapes=[pltpu.VMEM((acc_rows, _LANE), jnp.float32)],
        # "parallel" is the portable megacore sharding mechanism; on v7x,
        # pltpu.CORE_PARALLEL on axis 0 can be tried to force 2-TC sharding.
        compiler_params=pltpu.CompilerParams(
            dimension_semantics=("parallel", "arbitrary"),
            vmem_limit_bytes=vmem_limit),
    )(y2d, yh2d)

    return jnp.sum(partials)


def rmse_loss(y: jax.Array, y_hat: jax.Array, eps: float = 1e-7) -> jax.Array:
    assert y.shape == y_hat.shape, "y and y_hat must have the same shape"
    n = y.size

    # Flatten in native dtype (kernel upcasts; no f32 copy pass in HBM).
    flat_y = y.reshape(-1)
    flat_yh = y_hat.reshape(-1)

    n_main = (n // _LANE) * _LANE   # 128-aligned prefix handled by the kernel

    sse = jnp.float32(0.0)
    if n_main < n:
        # <128-element tail: fold its squared error into the scalar finalize
        # in plain JAX instead of jnp.pad-ing (and re-writing) both inputs.
        ty = flat_y[n_main:].astype(jnp.float32)
        tyh = flat_yh[n_main:].astype(jnp.float32)
        sse = sse + jnp.sum((ty - tyh) ** 2)

    if n_main > 0:
        rows = n_main // _LANE
        y2d = flat_y[:n_main].reshape(rows, _LANE)
        yh2d = flat_yh[:n_main].reshape(rows, _LANE)
        sse = sse + _sse_pallas(y2d, yh2d)

    return jnp.sqrt(sse / jnp.float32(n) + jnp.float32(eps))


if __name__ == "__main__":
    key = jax.random.PRNGKey(0)
    k1, k2 = jax.random.split(key)
    shape = (2, 4, 16, 16)   # small (B, C, H, W) regression target
    y = jax.random.normal(k1, shape, dtype=jnp.float32)
    y_hat = jax.random.normal(k2, shape, dtype=jnp.float32)

    out = rmse_loss(y, y_hat)
    out = jax.block_until_ready(out)

    # Pure-JAX reference check.
    ref = jnp.sqrt(jnp.mean((y - y_hat) ** 2) + 1e-7)
    assert jnp.allclose(out, ref, rtol=1e-5, atol=1e-6), (out, ref)

    print("KERNEL_OK")
</pallas_src>

<mosaic_0001>
module attributes {stable_mosaic.version = 11 : i64} {
  func.func @_rmse_partial_kernel(%arg0: i32, %arg1: i32, %arg2: memref<16x128xf32, #tpu.memory_space<vmem>>, %arg3: memref<16x128xf32, #tpu.memory_space<vmem>>, %arg4: memref<1x1xf32, #tpu.memory_space<smem>>, %arg5: memref<8x128xf32, #tpu.memory_space<vmem>>) attributes {dimension_semantics = [#tpu.dimension_semantics<parallel>, #tpu.dimension_semantics<arbitrary>], iteration_bounds = array<i64: 1, 1>, scalar_prefetch = 0 : i64, scratch_operands = 1 : i64, tpu.core_type = #tpu.core_type<tc>, window_params = [{transform_indices = @transform_0, window_bounds = array<i64: 16, 128>}, {transform_indices = @transform_1, window_bounds = array<i64: 16, 128>}, {transform_indices = @transform_2, window_bounds = array<i64: 1, 1>}]} {
    %c0_i32 = arith.constant 0 : i32
    %0 = arith.cmpi eq, %arg1, %c0_i32 : i32
    %1 = arith.extui %0 : i1 to i32
    %c0_i32_0 = arith.constant 0 : i32
    %2 = arith.cmpi ne, %1, %c0_i32_0 : i32
    scf.if %2 {
      %cst_10 = arith.constant 0.000000e+00 : f32
      %15 = vector.broadcast %cst_10 : f32 to vector<8x128xf32>
      %c0_11 = arith.constant 0 : index
      %c0_12 = arith.constant 0 : index
      %16 = vector.load %arg5[%c0_11, %c0_12] : memref<8x128xf32, #tpu.memory_space<vmem>>, vector<8x128xf32>
      tpu.vector_store %arg5[%c0_11, %c0_12], %15 {strides = array<i32>} : memref<8x128xf32, #tpu.memory_space<vmem>>, vector<8x128xf32>,
    } else {
    }
    %c0 = arith.constant 0 : index
    %c0_1 = arith.constant 0 : index
    %3 = vector.load %arg2[%c0, %c0_1] : memref<16x128xf32, #tpu.memory_space<vmem>>, vector<16x128xf32>
    %c0_2 = arith.constant 0 : index
    %c0_3 = arith.constant 0 : index
    %4 = vector.load %arg3[%c0_2, %c0_3] : memref<16x128xf32, #tpu.memory_space<vmem>>, vector<16x128xf32>
    %5 = arith.subf %3, %4 : vector<16x128xf32>
    %6 = arith.mulf %5, %5 : vector<16x128xf32>
    %c0_4 = arith.constant 0 : index
    %c0_5 = arith.constant 0 : index
    %7 = vector.load %arg5[%c0_4, %c0_5] : memref<8x128xf32, #tpu.memory_space<vmem>>, vector<8x128xf32>
    %8 = vector.shape_cast %6 : vector<16x128xf32> to vector<2x8x128xf32>
    %cst = arith.constant dense<0.000000e+00> : vector<8x128xf32>
    %9 = vector.multi_reduction <add>, %8, %cst [0] : vector<2x8x128xf32> to vector<8x128xf32>
    %10 = arith.addf %7, %9 : vector<8x128xf32>
    %c0_6 = arith.constant 0 : index
    %c0_7 = arith.constant 0 : index
    %11 = vector.load %arg5[%c0_6, %c0_7] : memref<8x128xf32, #tpu.memory_space<vmem>>, vector<8x128xf32>
    tpu.vector_store %arg5[%c0_6, %c0_7], %10 {strides = array<i32>} : memref<8x128xf32, #tpu.memory_space<vmem>>, vector<8x128xf32>,
    %c0_i32_8 = arith.constant 0 : i32
    %12 = arith.cmpi eq, %arg1, %c0_i32_8 : i32
    %13 = arith.extui %12 : i1 to i32
    %c0_i32_9 = arith.constant 0 : i32
    %14 = arith.cmpi ne, %13, %c0_i32_9 : i32
    scf.if %14 {
      %c0_10 = arith.constant 0 : index
      %c0_11 = arith.constant 0 : index
      %15 = vector.load %arg5[%c0_10, %c0_11] : memref<8x128xf32, #tpu.memory_space<vmem>>, vector<8x128xf32>
      %16 = vector.shape_cast %15 : vector<8x128xf32> to vector<1x8x128xf32>
      %cst_12 = arith.constant dense<0.000000e+00> : vector<1xf32>
      %17 = vector.multi_reduction <add>, %16, %cst_12 [1, 2] : vector<1x8x128xf32> to vector<1xf32>
      %18 = vector.shape_cast %17 : vector<1xf32> to vector<1x1x1xf32>
      %19 = vector.extract %18[0, 0, 0] : f32 from vector<1x1x1xf32>
      %c0_13 = arith.constant 0 : index
      %c0_14 = arith.constant 0 : index
      %20 = memref.load %arg4[%c0_13, %c0_14] : memref<1x1xf32, #tpu.memory_space<smem>>
      memref.store %19, %arg4[%c0_13, %c0_14] : memref<1x1xf32, #tpu.memory_space<smem>>
    } else {
    }
    return
  }
  func.func @transform_0(%arg0: i32, %arg1: i32) -> (i32, i32) {
    %c1_i32 = arith.constant 1 : i32
    %0 = arith.muli %arg0, %c1_i32 : i32
    %1 = arith.addi %0, %arg1 : i32
    %c0_i32 = arith.constant 0 : i32
    %c0_i32_0 = arith.constant 0 : i32
    return %1, %c0_i32 : i32, i32
  }
  func.func @transform_1(%arg0: i32, %arg1: i32) -> (i32, i32) {
    %c1_i32 = arith.constant 1 : i32
    %0 = arith.muli %arg0, %c1_i32 : i32
    %1 = arith.addi %0, %arg1 : i32
    %c0_i32 = arith.constant 0 : i32
    %c0_i32_0 = arith.constant 0 : i32
    return %1, %c0_i32 : i32, i32
  }
  func.func @transform_2(%arg0: i32, %arg1: i32) -> (i32, i32) {
    %c0_i32 = arith.constant 0 : i32
    %c0_i32_0 = arith.constant 0 : i32
    return %arg0, %c0_i32 : i32, i32
  }
}

</mosaic_0001>

<bundles_post_ra>
// kernel: tpu_custom_call.1
= control target key start
LH: loop header
LB: loop body
LE: loop exit
PB: predicated region body
PF: predicated region fallthrough
CT: control target
= control target key end

     0   :  { %7 = vsyncpa [#allocation4], 0  ;;  %s189_s0 = inlined_call_operand.hbm [shape: f32[16,128], index: 0, kind: input, shape index: {}]   ;;  %s190_s1 = inlined_call_operand.hbm [shape: f32[16,128], index: 1, kind: input, shape index: {}]   ;;  %s191_s2 = inlined_call_operand.hbm [shape: f32[1,1], index: 2, kind: output, shape index: {}]  }
   0x1   :  { %8 = vsyncpa [#allocation7], 0 }
   0x2   :  { %9 = vsyncpa [#allocation5], 0  ;;  %s160_s9 = smov [#allocation3]  }
   0x3   :  { %s19_s10 = sshll.u32 %s160_s9, 4  ;;  %s20_s10 = int_to_ptr.vmem [resolvable:$true] %s19_s10 }
   0x4   :  { %s114_s11 = scalar_lea.vmem %s20_s10, 256  ;;  %p119_p1 = scmp.lt.s32.totalorder %s20_s10, %s20_s10 }
   0x5   :  { %p115_p0 = scmp.ne.s32.totalorder %s20_s10, %s114_s11  ;;  %p120_p2 = scmp.lt.s32.totalorder %s114_s11, %s114_s11 }
   0x7   :  { %p121_p3 = por %p120_p2, %p119_p1 }
   0x9   :  { %p122_p4 = pnand %p121_p3, %p115_p0 }
   0xb   :  { %125 = shalt.err (!%p122_p4)
}
   0xc   :  { %s161_s12 = smov 128   ;;  %s162_s13 = smov 8  }
   0xd   :  { %25 = dma.hbm_to_vmem [thread:$0]  %s189_s0, 256, %s20_s10, [#allocation4], %s161_s12, %s161_s12, %s162_s13  }
   0xe   :  { %s163_s16 = smov [#allocation6]  }
   0xf   :  { %s35_s17 = sshll.u32 %s163_s16, 4  ;;  %s36_s17 = int_to_ptr.vmem [resolvable:$true] %s35_s17 }
  0x10   :  { %s134_s18 = scalar_lea.vmem %s36_s17, 256  ;;  %p139_p6 = scmp.lt.s32.totalorder %s36_s17, %s36_s17 }
  0x11   :  { %p135_p5 = scmp.ne.s32.totalorder %s36_s17, %s134_s18  ;;  %p140_p7 = scmp.lt.s32.totalorder %s134_s18, %s134_s18 }
  0x13   :  { %p141_p8 = por %p140_p7, %p139_p6 }
  0x15   :  { %p142_p9 = pnand %p141_p8, %p135_p5 }
  0x17   :  { %145 = shalt.err (!%p142_p9)
}
  0x18   :  { %41 = dma.hbm_to_vmem [thread:$0]  %s190_s1, 256, %s36_s17, [#allocation7], %s161_s12, %s161_s12, %s162_s13  }
  0x19   :  { %154 = dma.done.wait [#allocation4], 256  }
  0x1a   :  { %155 = vsyncadd [#allocation4], 4294967040 }
  0x1b   :  { %156 = dma.done.wait [#allocation7], 256  }
  0x1c   :  { %157 = vsyncadd [#allocation7], 4294967040  ;;  %v57_v0 = vld [vmem:[#allocation3] sm:$0xff]  ;;  %v58_v1 = vld [vmem:[#allocation3 + $0x8] sm:$0xff]  ;;  %s164_s1 = smov [#allocation8]  }
  0x1d   :  { %v59_v2 = vld [vmem:[#allocation6] sm:$0xff]  ;;  %v60_v3 = vld [vmem:[#allocation6 + $0x8] sm:$0xff] }
  0x1e   :  { %v61_v4 = vsub.f32 %v57_v0, %v59_v2  ;;  %v62_v5 = vsub.f32 %v58_v1, %v60_v3 }
  0x20   :  { %v63_v6 = vmul.f32 %v61_v4, %v61_v4  ;;  %v64_v7 = vmul.f32 %v62_v5, %v62_v5 }
  0x22   :  { %v66_v8 = vadd.f32 %v64_v7, %v63_v6 }
  0x24   :  { %73 = vadd.xlane.f32.xlu0 %v66_v8 }
  0xad   :  { %v74_v9 = vpop.xlane.xlu0 %73 }
  0xae   :  { %v75_v10 = vrot.slane %v74_v9, 4 }
  0xb0   :  { %v76_v11 = vadd.f32 %v75_v10, %v74_v9 }
  0xb2   :  { %v77_v12 = vrot.slane %v76_v11, 2 }
  0xb4   :  { %v78_v13 = vadd.f32 %v77_v12, %v76_v11 }
  0xb6   :  { %v79_v14 = vrot.slane %v78_v13, 1 }
  0xb8   :  { %v80_v15 = vadd.f32 %v79_v14, %v78_v13 }
  0xba   :  { %99 = vpush %v80_v15 }
  0xeb   :  { %s100_s0 = spop %99 }
  0xec   :  { %83 = sst [smem:[#allocation8]] %s100_s0 }
  0xed   :  { %91 = dma.smem_to_hbm %s164_s1, 16, %s191_s2, [#allocation5]  }
  0xee   :  { %158 = dma.done.wait [#allocation5], 16  }
  0xef   :  { %159 = vsyncadd [#allocation5], 4294967280 }
  0xf0   :  { %95 = sfence }
  0xf1   :  { %96 = vsyncpa [#allocation4], 1 }
  0xf2   :  { %97 = vsyncpa [#allocation7], 1 }
  0xf3   :  { %98 = vsyncpa [#allocation5], 1 }

</bundles_post_ra>
